<compile_context>
chip_gen: v6e
topology: v6e:2x2x1
jax: 0.10.0
libtpu: 0.0.40
codegen_flags: <defaults>
</compile_context>

<pallas_src>
import functools

import jax
import jax.numpy as jnp
from jax import lax
from jax.experimental import pallas as pl
from jax.experimental.pallas import tpu as pltpu

_NEG_INF = -1000000000.0

_VMEM_LIMIT_CACHE = None


def _vmem_limit_bytes():
    """Per-generation scoped-VMEM budget: ~70% of physical VMEM, capped at 100 MiB.
    v5e/v6e (128 MiB phys) -> ~90 MiB; v7x (64 MiB phys) -> ~45 MiB."""
    global _VMEM_LIMIT_CACHE
    if _VMEM_LIMIT_CACHE is None:
        cap = 64 * 1024 * 1024
        try:
            cap = int(pltpu.get_tpu_info().vmem_capacity_bytes)
        except Exception:
            pass
        _VMEM_LIMIT_CACHE = max(32 * 1024 * 1024,
                                min(int(cap * 0.70), 100 * 1024 * 1024))
    return _VMEM_LIMIT_CACHE


def _compiler_params(n_axes):
    return pltpu.CompilerParams(
        dimension_semantics=("parallel",) * n_axes,
        vmem_limit_bytes=_vmem_limit_bytes(),
    )


def _row_tile(m, bytes_per_row, fixed_bytes=0, cap=1024):
    """Largest row tile whose (double-buffered) working set fits ~half the budget."""
    budget = _vmem_limit_bytes() // 2 - fixed_bytes
    max_rows = max(8, budget // max(bytes_per_row, 1))
    cap = int(min(cap, max_rows))
    if m <= cap:
        return m                       # full extent (always legal)
    for t in (1024, 512, 256, 128, 64, 32, 16, 8):
        if t <= cap and m % t == 0:
            return t
    return max(8, (min(cap, 256) // 8) * 8)   # partial last block masked by Pallas


# ----------------------------------------------------------------------------
# Kernel 1: fused projections.  q and k share w_qs (reference quirk), v uses w_vs.
# Weights arrive pre-cast to bf16; activations cast in-kernel; f32 accumulation;
# bf16 outputs (attention consumes bf16 anyway).
# ----------------------------------------------------------------------------
def _proj_self_kernel(x_ref, wq_ref, bq_ref, wv_ref, bv_ref, oq_ref, ov_ref):
    x = x_ref[...].astype(jnp.bfloat16)
    oq_ref[...] = (jnp.dot(x, wq_ref[...], preferred_element_type=jnp.float32)
                   + bq_ref[...]).astype(oq_ref.dtype)
    ov_ref[...] = (jnp.dot(x, wv_ref[...], preferred_element_type=jnp.float32)
                   + bv_ref[...]).astype(ov_ref.dtype)


def _proj_qkv_kernel(xq_ref, xk_ref, xv_ref, wq_ref, bq_ref, wv_ref, bv_ref,
                     oq_ref, ok_ref, ov_ref):
    wq = wq_ref[...]
    bq = bq_ref[...]
    oq_ref[...] = (jnp.dot(xq_ref[...].astype(jnp.bfloat16), wq,
                           preferred_element_type=jnp.float32) + bq).astype(oq_ref.dtype)
    ok_ref[...] = (jnp.dot(xk_ref[...].astype(jnp.bfloat16), wq,
                           preferred_element_type=jnp.float32) + bq).astype(ok_ref.dtype)
    ov_ref[...] = (jnp.dot(xv_ref[...].astype(jnp.bfloat16), wv_ref[...],
                           preferred_element_type=jnp.float32)
                   + bv_ref[...]).astype(ov_ref.dtype)


def _linear_kernel(x_ref, w_ref, b_ref, o_ref):
    o_ref[...] = (jnp.dot(x_ref[...].astype(jnp.bfloat16), w_ref[...],
                          preferred_element_type=jnp.float32)
                  + b_ref[...]).astype(o_ref.dtype)


def pallas_self_proj(x2d, wq_bf, bq, wv_bf, bv):
    m, d_in = x2d.shape
    dq, dv = wq_bf.shape[1], wv_bf.shape[1]
    per_row = 2 * (d_in * 4 + (dq + dv) * 2)
    fixed = 2 * 2 * d_in * (dq + dv)
    tm = _row_tile(m, per_row, fixed)
    return pl.pallas_call(
        _proj_self_kernel,
        out_shape=(jax.ShapeDtypeStruct((m, dq), jnp.bfloat16),
                   jax.ShapeDtypeStruct((m, dv), jnp.bfloat16)),
        grid=(pl.cdiv(m, tm),),
        in_specs=[
            pl.BlockSpec((tm, d_in), lambda i: (i, 0)),
            pl.BlockSpec((d_in, dq), lambda i: (0, 0)),
            pl.BlockSpec((1, dq), lambda i: (0, 0)),
            pl.BlockSpec((d_in, dv), lambda i: (0, 0)),
            pl.BlockSpec((1, dv), lambda i: (0, 0)),
        ],
        out_specs=(pl.BlockSpec((tm, dq), lambda i: (i, 0)),
                   pl.BlockSpec((tm, dv), lambda i: (i, 0))),
        compiler_params=_compiler_params(1),
    )(x2d, wq_bf, bq.reshape(1, dq), wv_bf, bv.reshape(1, dv))


def pallas_qkv_proj(q2d, k2d, v2d, wq_bf, bq, wv_bf, bv):
    m, d_in = q2d.shape
    dq, dv = wq_bf.shape[1], wv_bf.shape[1]
    per_row = 2 * (3 * d_in * 4 + (2 * dq + dv) * 2)
    fixed = 2 * 2 * d_in * (dq + dv)
    tm = _row_tile(m, per_row, fixed)
    return pl.pallas_call(
        _proj_qkv_kernel,
        out_shape=(jax.ShapeDtypeStruct((m, dq), jnp.bfloat16),
                   jax.ShapeDtypeStruct((m, dq), jnp.bfloat16),
                   jax.ShapeDtypeStruct((m, dv), jnp.bfloat16)),
        grid=(pl.cdiv(m, tm),),
        in_specs=[
            pl.BlockSpec((tm, d_in), lambda i: (i, 0)),
            pl.BlockSpec((tm, d_in), lambda i: (i, 0)),
            pl.BlockSpec((tm, d_in), lambda i: (i, 0)),
            pl.BlockSpec((d_in, dq), lambda i: (0, 0)),
            pl.BlockSpec((1, dq), lambda i: (0, 0)),
            pl.BlockSpec((d_in, dv), lambda i: (0, 0)),
            pl.BlockSpec((1, dv), lambda i: (0, 0)),
        ],
        out_specs=(pl.BlockSpec((tm, dq), lambda i: (i, 0)),
                   pl.BlockSpec((tm, dq), lambda i: (i, 0)),
                   pl.BlockSpec((tm, dv), lambda i: (i, 0))),
        compiler_params=_compiler_params(1),
    )(q2d, k2d, v2d, wq_bf, bq.reshape(1, dq), wv_bf, bv.reshape(1, dv))


def pallas_linear(x2d, w_bf, b):
    m, d_in = x2d.shape
    d_out = w_bf.shape[1]
    per_row = 2 * (d_in * 4 + d_out * 2)
    fixed = 2 * 2 * d_in * d_out
    tm = _row_tile(m, per_row, fixed)
    return pl.pallas_call(
        _linear_kernel,
        out_shape=jax.ShapeDtypeStruct((m, d_out), jnp.bfloat16),
        grid=(pl.cdiv(m, tm),),
        in_specs=[
            pl.BlockSpec((tm, d_in), lambda i: (i, 0)),
            pl.BlockSpec((d_in, d_out), lambda i: (0, 0)),
            pl.BlockSpec((1, d_out), lambda i: (0, 0)),
        ],
        out_specs=pl.BlockSpec((tm, d_out), lambda i: (i, 0)),
        compiler_params=_compiler_params(1),
    )(x2d, w_bf, b.reshape(1, d_out))


# ----------------------------------------------------------------------------
# Kernel 2: scaled dot-product attention, grid = (B, H, lq tiles), lk whole per step
# (the full probability tensor is a module output, so it must be written anyway).
# ----------------------------------------------------------------------------
def _attn_kernel(q_ref, k_ref, v_ref, o_ref, a_ref, *, scale):
    q = (q_ref[0, 0].astype(jnp.float32) * scale).astype(jnp.bfloat16)   # (tq, dk)
    k = k_ref[0, 0]                                                       # (lk, dk) bf16
    v = v_ref[0, 0]                                                       # (lk, dv) bf16
    s = lax.dot_general(q, k, (((1,), (1,)), ((), ())),
                        preferred_element_type=jnp.float32)               # (tq, lk)
    s_max = jnp.max(s, axis=-1, keepdims=True)
    e = jnp.exp(s - s_max)
    p = e / jnp.sum(e, axis=-1, keepdims=True)     # exact softmax (reference parity)
    a_ref[0, 0] = p
    o_ref[0, 0] = jnp.dot(p.astype(jnp.bfloat16), v,
                          preferred_element_type=jnp.float32).astype(o_ref.dtype)


def _attn_kernel_masked(q_ref, k_ref, v_ref, m_ref, o_ref, a_ref, *, scale):
    q = (q_ref[0, 0].astype(jnp.float32) * scale).astype(jnp.bfloat16)
    k = k_ref[0, 0]
    v = v_ref[0, 0]
    s = lax.dot_general(q, k, (((1,), (1,)), ((), ())),
                        preferred_element_type=jnp.float32)
    s = jnp.where(m_ref[0] != 0, _NEG_INF, s)      # masked_fill(mask == 1, -1e9)
    s_max = jnp.max(s, axis=-1, keepdims=True)
    e = jnp.exp(s - s_max)
    p = e / jnp.sum(e, axis=-1, keepdims=True)
    a_ref[0, 0] = p
    o_ref[0, 0] = jnp.dot(p.astype(jnp.bfloat16), v,
                          preferred_element_type=jnp.float32).astype(o_ref.dtype)


def _q_tile(lq, lk):
    # keep the (tq, lk) f32 score/prob working set well under the VMEM budget
    budget = _vmem_limit_bytes() // 3
    max_rows = max(8, budget // max(lk * 24, 1))
    cap = int(min(256, max_rows))
    if lq <= cap:
        return lq
    for t in (256, 128, 64, 32, 16, 8):
        if t <= cap and lq % t == 0:
            return t
    return max(8, (min(cap, 128) // 8) * 8)


def pallas_attention(qh, kh, vh, mask, temperature):
    b, h, lq, dk = qh.shape
    lk = kh.shape[2]
    dv = vh.shape[3]
    scale = 1.0 / float(temperature)
    tq = _q_tile(lq, lk)
    grid = (b, h, pl.cdiv(lq, tq))

    q_spec = pl.BlockSpec((1, 1, tq, dk), lambda bi, hi, qi: (bi, hi, qi, 0))
    k_spec = pl.BlockSpec((1, 1, lk, dk), lambda bi, hi, qi: (bi, hi, 0, 0))
    v_spec = pl.BlockSpec((1, 1, lk, dv), lambda bi, hi, qi: (bi, hi, 0, 0))
    out_specs = (
        pl.BlockSpec((1, 1, tq, dv), lambda bi, hi, qi: (bi, hi, qi, 0)),
        pl.BlockSpec((1, 1, tq, lk), lambda bi, hi, qi: (bi, hi, qi, 0)),
    )
    out_shape = (
        jax.ShapeDtypeStruct((b, h, lq, dv), jnp.bfloat16),   # context (bf16 -> fc)
        jax.ShapeDtypeStruct((b, h, lq, lk), jnp.float32),    # attention probs (returned)
    )
    cparams = _compiler_params(3)

    if mask is None:
        kernel = functools.partial(_attn_kernel, scale=scale)
        return pl.pallas_call(
            kernel, out_shape=out_shape, grid=grid,
            in_specs=[q_spec, k_spec, v_spec],
            out_specs=out_specs, compiler_params=cparams,
        )(qh, kh, vh)

    m = (mask == 1)
    if m.ndim == 2:
        m = m[None]
    mb = m.shape[0]
    m = jnp.broadcast_to(m, (mb, lq, lk)).astype(jnp.bfloat16)
    if mb == 1:   # shared mask: reuse block 0 across the batch grid axis (no broadcast in HBM)
        m_spec = pl.BlockSpec((1, tq, lk), lambda bi, hi, qi: (0, qi, 0))
    else:
        m_spec = pl.BlockSpec((1, tq, lk), lambda bi, hi, qi: (bi, qi, 0))
    kernel = functools.partial(_attn_kernel_masked, scale=scale)
    return pl.pallas_call(
        kernel, out_shape=out_shape, grid=grid,
        in_specs=[q_spec, k_spec, v_spec, m_spec],
        out_specs=out_specs, compiler_params=cparams,
    )(qh, kh, vh, m)


# ----------------------------------------------------------------------------
# Kernel 3: fc projection + residual add + LayerNorm (fused epilogue), row-tiled.
# ----------------------------------------------------------------------------
def _fc_res_ln_kernel(x_ref, w_ref, b_ref, r_ref, g_ref, be_ref, o_ref, *, eps):
    y = jnp.dot(x_ref[...], w_ref[...],
                preferred_element_type=jnp.float32) + b_ref[...]
    y = y + r_ref[...]                                        # output + residual
    mean = jnp.mean(y, axis=-1, keepdims=True)
    var = jnp.mean(jnp.square(y - mean), axis=-1, keepdims=True)
    yn = (y - mean) * lax.rsqrt(var + eps)
    o_ref[...] = yn * g_ref[...] + be_ref[...]


def pallas_fc_res_ln(x2d, w_bf, b, res2d, gamma, beta, eps=1e-5):
    m, d_in = x2d.shape
    d_out = w_bf.shape[1]
    per_row = 2 * (d_in * 2 + 2 * d_out * 4) + 4 * d_out * 4
    fixed = 2 * 2 * d_in * d_out
    tm = _row_tile(m, per_row, fixed)
    kernel = functools.partial(_fc_res_ln_kernel, eps=eps)
    return pl.pallas_call(
        kernel,
        out_shape=jax.ShapeDtypeStruct((m, d_out), jnp.float32),
        grid=(pl.cdiv(m, tm),),
        in_specs=[
            pl.BlockSpec((tm, d_in), lambda i: (i, 0)),
            pl.BlockSpec((d_in, d_out), lambda i: (0, 0)),
            pl.BlockSpec((1, d_out), lambda i: (0, 0)),
            pl.BlockSpec((tm, d_out), lambda i: (i, 0)),
            pl.BlockSpec((1, d_out), lambda i: (0, 0)),
            pl.BlockSpec((1, d_out), lambda i: (0, 0)),
        ],
        out_specs=pl.BlockSpec((tm, d_out), lambda i: (i, 0)),
        compiler_params=_compiler_params(1),
    )(x2d, w_bf, b.reshape(1, d_out), res2d,
      gamma.reshape(1, d_out), beta.reshape(1, d_out))


# ----------------------------------------------------------------------------
# Module wrapper (parameter setup + glue reshapes in plain JAX)
# ----------------------------------------------------------------------------
class MultiHeadAttentionPallas:
    def __init__(self, n_head, d_model, d_k, d_v, dropout, key):
        d_k = d_k // n_head
        d_v = d_v // n_head
        self.n_head, self.d_k, self.d_v, self.d_model = n_head, d_k, d_v, d_model
        self.temperature = float(d_k) ** 0.5
        self.dropout = dropout  # identity (eval / rate 0.0)

        k1, k2, k3, k4, k5, k6, k7 = jax.random.split(key, 7)
        lim_in = 1.0 / (d_model ** 0.5)

        def uinit(k, shape, lim):
            return jax.random.uniform(k, shape, jnp.float32, -lim, lim)

        # nn.Linear(d_model, n_head*d_k) -> weight (out,in); stored transposed (in,out)
        self.w_qs_t = uinit(k1, (d_model, n_head * d_k), lim_in)
        self.b_qs = uinit(k2, (n_head * d_k,), lim_in)
        # w_ks: created (as in __init__) but unused in forward — quirk preserved.
        self.w_ks_t = uinit(k3, (d_model, n_head * d_k), lim_in)
        self.b_ks = jnp.zeros((n_head * d_k,), jnp.float32)
        self.w_vs_t = uinit(k4, (d_model, n_head * d_v), lim_in)
        self.b_vs = uinit(k5, (n_head * d_v,), lim_in)
        # fc: Linear(n_head*d_v, d_model), xavier_normal weight
        fan_in, fan_out = n_head * d_v, d_model
        std = (2.0 / (fan_in + fan_out)) ** 0.5
        self.w_fc_t = std * jax.random.normal(k6, (n_head * d_v, d_model), jnp.float32)
        self.b_fc = uinit(k7, (d_model,), 1.0 / (fan_in ** 0.5))
        # LayerNorm(d_model)
        self.ln_gamma = jnp.ones((d_model,), jnp.float32)
        self.ln_beta = jnp.zeros((d_model,), jnp.float32)

        # bf16 weight copies used by the kernels (halve weight DMA / VMEM residency)
        self.w_qs_bf16 = self.w_qs_t.astype(jnp.bfloat16)
        self.w_vs_bf16 = self.w_vs_t.astype(jnp.bfloat16)
        self.w_fc_bf16 = self.w_fc_t.astype(jnp.bfloat16)

    def __call__(self, q, k, v, mask=None):
        n_head, d_k, d_v, d_model = self.n_head, self.d_k, self.d_v, self.d_model
        sz_b, len_q, _ = q.shape
        len_k = k.shape[1]
        len_v = v.shape[1]
        residual = q

        q2d = q.reshape(-1, d_model)
        k2d = k.reshape(-1, d_model)
        v2d = v.reshape(-1, d_model)

        if (k is q) and (v is q):
            # Self-attention: DMA rows once; q and k share w_qs so kp == qp.
            qp, vp = pallas_self_proj(q2d, self.w_qs_bf16, self.b_qs,
                                      self.w_vs_bf16, self.b_vs)
            kp = qp
        elif len_q == len_k == len_v:
            # Fused projection: q and k both use w_qs (reference quirk), v uses w_vs.
            qp, kp, vp = pallas_qkv_proj(q2d, k2d, v2d,
                                         self.w_qs_bf16, self.b_qs,
                                         self.w_vs_bf16, self.b_vs)
        else:
            qp = pallas_linear(q2d, self.w_qs_bf16, self.b_qs)
            kp = pallas_linear(k2d, self.w_qs_bf16, self.b_qs)  # w_qs on k (quirk)
            vp = pallas_linear(v2d, self.w_vs_bf16, self.b_vs)

        qh = jnp.transpose(qp.reshape(sz_b, len_q, n_head, d_k), (0, 2, 1, 3))
        kh = jnp.transpose(kp.reshape(sz_b, len_k, n_head, d_k), (0, 2, 1, 3))
        vh = jnp.transpose(vp.reshape(sz_b, len_v, n_head, d_v), (0, 2, 1, 3))

        out, attn = pallas_attention(qh, kh, vh, mask, self.temperature)

        # Quirky memory re-interpretation from the reference forward():
        #   view(n_head, sz_b, len_q, d_v).transpose(1, 2).contiguous().view(sz_b, len_q, -1)
        out = out.reshape(n_head, sz_b, len_q, d_v)
        out = jnp.transpose(out, (0, 2, 1, 3))
        out = out.reshape(sz_b, len_q, n_head * d_v)

        final = pallas_fc_res_ln(
            out.reshape(sz_b * len_q, n_head * d_v),
            self.w_fc_bf16, self.b_fc,
            residual.reshape(sz_b * len_q, d_model),
            self.ln_gamma, self.ln_beta,
        ).reshape(sz_b, len_q, d_model)
        return final, attn


if __name__ == "__main__":
    # Small deterministic example: n_head=4, d_model=32, d_k=d_v=32 (per-head 8),
    # batch=2, seq=8.
    key = jax.random.PRNGKey(0)
    kp_, kq_, kk_, kv_ = jax.random.split(key, 4)

    n_head, d_model, d_k, d_v = 4, 32, 32, 32
    sz_b, seq = 2, 8

    mha = MultiHeadAttentionPallas(n_head, d_model, d_k, d_v, dropout=0.0, key=kp_)

    q = jax.random.normal(kq_, (sz_b, seq, d_model), jnp.float32)
    k = jax.random.normal(kk_, (sz_b, seq, d_model), jnp.float32)
    v = jax.random.normal(kv_, (sz_b, seq, d_model), jnp.float32)

    # Causal-style mask: 1 where the score should be masked.
    idx = jnp.arange(seq)
    causal = (idx[None, :] > idx[:, None]).astype(jnp.int32)          # (seq, seq)
    mask = jnp.broadcast_to(causal[None], (sz_b, seq, seq))           # (B, seq, seq)

    # General cross-attention path (no mask).
    fwd = jax.jit(lambda a, b_, c: mha(a, b_, c, mask=None))
    out1, attn1 = fwd(q, k, v)

    # Self-attention path (q is k is v) with mask.
    self_fwd = jax.jit(lambda x, m: mha(x, x, x, mask=m))
    out2, attn2 = self_fwd(q, mask)

    jax.block_until_ready((out1, attn1, out2, attn2))

    assert out1.shape == (sz_b, seq, d_model)
    assert attn1.shape == (sz_b, n_head, seq, seq)
    assert out2.shape == (sz_b, seq, d_model)
    assert attn2.shape == (sz_b, n_head, seq, seq)
    assert bool(jnp.all(jnp.isfinite(out1))) and bool(jnp.all(jnp.isfinite(attn1)))
    assert bool(jnp.all(jnp.isfinite(out2))) and bool(jnp.all(jnp.isfinite(attn2)))
    # exact softmax normalization -> rows sum to 1
    assert bool(jnp.allclose(jnp.sum(attn1, axis=-1), 1.0, atol=1e-3))
    assert bool(jnp.allclose(jnp.sum(attn2, axis=-1), 1.0, atol=1e-3))
    # masked positions carry ~zero probability
    masked_probs = attn2 * mask[:, None, :, :].astype(jnp.float32)
    assert bool(jnp.max(masked_probs) < 1e-6)
    print("KERNEL_OK")
</pallas_src>

<mosaic_0001>
module attributes {stable_mosaic.version = 11 : i64} {
  func.func @_proj_qkv_kernel(%arg0: i32, %arg1: memref<16x32xf32, #tpu.memory_space<vmem>>, %arg2: memref<16x32xf32, #tpu.memory_space<vmem>>, %arg3: memref<16x32xf32, #tpu.memory_space<vmem>>, %arg4: memref<32x32xbf16, #tpu.memory_space<vmem>>, %arg5: memref<1x32xf32, #tpu.memory_space<vmem>>, %arg6: memref<32x32xbf16, #tpu.memory_space<vmem>>, %arg7: memref<1x32xf32, #tpu.memory_space<vmem>>, %arg8: memref<16x32xbf16, #tpu.memory_space<vmem>>, %arg9: memref<16x32xbf16, #tpu.memory_space<vmem>>, %arg10: memref<16x32xbf16, #tpu.memory_space<vmem>>) attributes {dimension_semantics = [#tpu.dimension_semantics<parallel>], iteration_bounds = array<i64: 1>, scalar_prefetch = 0 : i64, scratch_operands = 0 : i64, tpu.core_type = #tpu.core_type<tc>, window_params = [{transform_indices = @transform_0, window_bounds = array<i64: 16, 32>}, {transform_indices = @transform_1, window_bounds = array<i64: 16, 32>}, {transform_indices = @transform_2, window_bounds = array<i64: 16, 32>}, {pipeline_mode = #tpu.pipeline_mode<synchronous>, transform_indices = @transform_3, window_bounds = array<i64: 32, 32>}, {pipeline_mode = #tpu.pipeline_mode<synchronous>, transform_indices = @transform_4, window_bounds = array<i64: 1, 32>}, {pipeline_mode = #tpu.pipeline_mode<synchronous>, transform_indices = @transform_5, window_bounds = array<i64: 32, 32>}, {pipeline_mode = #tpu.pipeline_mode<synchronous>, transform_indices = @transform_6, window_bounds = array<i64: 1, 32>}, {transform_indices = @transform_7, window_bounds = array<i64: 16, 32>}, {transform_indices = @transform_8, window_bounds = array<i64: 16, 32>}, {transform_indices = @transform_9, window_bounds = array<i64: 16, 32>}]} {
    %c0 = arith.constant 0 : index
    %c0_0 = arith.constant 0 : index
    %0 = vector.load %arg4[%c0, %c0_0] : memref<32x32xbf16, #tpu.memory_space<vmem>>, vector<32x32xbf16>
    %c0_1 = arith.constant 0 : index
    %c0_2 = arith.constant 0 : index
    %1 = vector.load %arg5[%c0_1, %c0_2] : memref<1x32xf32, #tpu.memory_space<vmem>>, vector<1x32xf32>
    %c0_3 = arith.constant 0 : index
    %c0_4 = arith.constant 0 : index
    %2 = vector.load %arg1[%c0_3, %c0_4] : memref<16x32xf32, #tpu.memory_space<vmem>>, vector<16x32xf32>
    %3 = arith.truncf %2 : vector<16x32xf32> to vector<16x32xbf16>
    %cst = arith.constant dense<0.000000e+00> : vector<16x32xf32>
    %4 = tpu.matmul %3, %0, %cst {dimension_numbers = #tpu.dot_dimension_numbers<[1], [0], [0], [1], [0, 0, 1, 1], [], []>} : vector<16x32xbf16>, vector<32x32xbf16>, vector<16x32xf32> -> vector<16x32xf32>
    %5 = vector.broadcast %1 : vector<1x32xf32> to vector<16x32xf32>
    %6 = arith.addf %4, %5 : vector<16x32xf32>
    %7 = arith.truncf %6 : vector<16x32xf32> to vector<16x32xbf16>
    %c0_5 = arith.constant 0 : index
    %c0_6 = arith.constant 0 : index
    %8 = vector.load %arg8[%c0_5, %c0_6] : memref<16x32xbf16, #tpu.memory_space<vmem>>, vector<16x32xbf16>
    tpu.vector_store %arg8[%c0_5, %c0_6], %7 {strides = array<i32>} : memref<16x32xbf16, #tpu.memory_space<vmem>>, vector<16x32xbf16>,
    %c0_7 = arith.constant 0 : index
    %c0_8 = arith.constant 0 : index
    %9 = vector.load %arg2[%c0_7, %c0_8] : memref<16x32xf32, #tpu.memory_space<vmem>>, vector<16x32xf32>
    %10 = arith.truncf %9 : vector<16x32xf32> to vector<16x32xbf16>
    %cst_9 = arith.constant dense<0.000000e+00> : vector<16x32xf32>
    %11 = tpu.matmul %10, %0, %cst_9 {dimension_numbers = #tpu.dot_dimension_numbers<[1], [0], [0], [1], [0, 0, 1, 1], [], []>} : vector<16x32xbf16>, vector<32x32xbf16>, vector<16x32xf32> -> vector<16x32xf32>
    %12 = vector.broadcast %1 : vector<1x32xf32> to vector<16x32xf32>
    %13 = arith.addf %11, %12 : vector<16x32xf32>
    %14 = arith.truncf %13 : vector<16x32xf32> to vector<16x32xbf16>
    %c0_10 = arith.constant 0 : index
    %c0_11 = arith.constant 0 : index
    %15 = vector.load %arg9[%c0_10, %c0_11] : memref<16x32xbf16, #tpu.memory_space<vmem>>, vector<16x32xbf16>
    tpu.vector_store %arg9[%c0_10, %c0_11], %14 {strides = array<i32>} : memref<16x32xbf16, #tpu.memory_space<vmem>>, vector<16x32xbf16>,
    %c0_12 = arith.constant 0 : index
    %c0_13 = arith.constant 0 : index
    %16 = vector.load %arg3[%c0_12, %c0_13] : memref<16x32xf32, #tpu.memory_space<vmem>>, vector<16x32xf32>
    %17 = arith.truncf %16 : vector<16x32xf32> to vector<16x32xbf16>
    %c0_14 = arith.constant 0 : index
    %c0_15 = arith.constant 0 : index
    %18 = vector.load %arg6[%c0_14, %c0_15] : memref<32x32xbf16, #tpu.memory_space<vmem>>, vector<32x32xbf16>
    %cst_16 = arith.constant dense<0.000000e+00> : vector<16x32xf32>
    %19 = tpu.matmul %17, %18, %cst_16 {dimension_numbers = #tpu.dot_dimension_numbers<[1], [0], [0], [1], [0, 0, 1, 1], [], []>} : vector<16x32xbf16>, vector<32x32xbf16>, vector<16x32xf32> -> vector<16x32xf32>
    %c0_17 = arith.constant 0 : index
    %c0_18 = arith.constant 0 : index
    %20 = vector.load %arg7[%c0_17, %c0_18] : memref<1x32xf32, #tpu.memory_space<vmem>>, vector<1x32xf32>
    %21 = vector.broadcast %20 : vector<1x32xf32> to vector<16x32xf32>
    %22 = arith.addf %19, %21 : vector<16x32xf32>
    %23 = arith.truncf %22 : vector<16x32xf32> to vector<16x32xbf16>
    %c0_19 = arith.constant 0 : index
    %c0_20 = arith.constant 0 : index
    %24 = vector.load %arg10[%c0_19, %c0_20] : memref<16x32xbf16, #tpu.memory_space<vmem>>, vector<16x32xbf16>
    tpu.vector_store %arg10[%c0_19, %c0_20], %23 {strides = array<i32>} : memref<16x32xbf16, #tpu.memory_space<vmem>>, vector<16x32xbf16>,
    return
  }
  func.func @transform_0(%arg0: i32) -> (i32, i32) {
    %c0_i32 = arith.constant 0 : i32
    %c0_i32_0 = arith.constant 0 : i32
    return %arg0, %c0_i32 : i32, i32
  }
  func.func @transform_1(%arg0: i32) -> (i32, i32) {
    %c0_i32 = arith.constant 0 : i32
    %c0_i32_0 = arith.constant 0 : i32
    return %arg0, %c0_i32 : i32, i32
  }
  func.func @transform_2(%arg0: i32) -> (i32, i32) {
    %c0_i32 = arith.constant 0 : i32
    %c0_i32_0 = arith.constant 0 : i32
    return %arg0, %c0_i32 : i32, i32
  }
  func.func @transform_3(%arg0: i32) -> (i32, i32) {
    %c0_i32 = arith.constant 0 : i32
    %c0_i32_0 = arith.constant 0 : i32
    %c0_i32_1 = arith.constant 0 : i32
    return %c0_i32, %c0_i32_0 : i32, i32
  }
  func.func @transform_4(%arg0: i32) -> (i32, i32) {
    %c0_i32 = arith.constant 0 : i32
    %c0_i32_0 = arith.constant 0 : i32
    %c0_i32_1 = arith.constant 0 : i32
    return %c0_i32, %c0_i32_0 : i32, i32
  }
  func.func @transform_5(%arg0: i32) -> (i32, i32) {
    %c0_i32 = arith.constant 0 : i32
    %c0_i32_0 = arith.constant 0 : i32
    %c0_i32_1 = arith.constant 0 : i32
    return %c0_i32, %c0_i32_0 : i32, i32
  }
  func.func @transform_6(%arg0: i32) -> (i32, i32) {
    %c0_i32 = arith.constant 0 : i32
    %c0_i32_0 = arith.constant 0 : i32
    %c0_i32_1 = arith.constant 0 : i32
    return %c0_i32, %c0_i32_0 : i32, i32
  }
  func.func @transform_7(%arg0: i32) -> (i32, i32) {
    %c0_i32 = arith.constant 0 : i32
    %c0_i32_0 = arith.constant 0 : i32
    return %arg0, %c0_i32 : i32, i32
  }
  func.func @transform_8(%arg0: i32) -> (i32, i32) {
    %c0_i32 = arith.constant 0 : i32
    %c0_i32_0 = arith.constant 0 : i32
    return %arg0, %c0_i32 : i32, i32
  }
  func.func @transform_9(%arg0: i32) -> (i32, i32) {
    %c0_i32 = arith.constant 0 : i32
    %c0_i32_0 = arith.constant 0 : i32
    return %arg0, %c0_i32 : i32, i32
  }
}

module attributes {stable_mosaic.version = 11 : i64} {
  func.func @_attn_kernel(%arg0: i32, %arg1: i32, %arg2: i32, %arg3: memref<1x1x8x8xbf16, #tpu.memory_space<vmem>>, %arg4: memref<1x1x8x8xbf16, #tpu.memory_space<vmem>>, %arg5: memref<1x1x8x8xbf16, #tpu.memory_space<vmem>>, %arg6: memref<1x1x8x8xbf16, #tpu.memory_space<vmem>>, %arg7: memref<1x1x8x8xf32, #tpu.memory_space<vmem>>) attributes {dimension_semantics = [#tpu.dimension_semantics<parallel>, #tpu.dimension_semantics<parallel>, #tpu.dimension_semantics<parallel>], iteration_bounds = array<i64: 2, 4, 1>, scalar_prefetch = 0 : i64, scratch_operands = 0 : i64, tpu.core_type = #tpu.core_type<tc>, window_params = [{transform_indices = @transform_0, window_bounds = array<i64: 1, 1, 8, 8>}, {transform_indices = @transform_1, window_bounds = array<i64: 1, 1, 8, 8>}, {transform_indices = @transform_2, window_bounds = array<i64: 1, 1, 8, 8>}, {transform_indices = @transform_3, window_bounds = array<i64: 1, 1, 8, 8>}, {transform_indices = @transform_4, window_bounds = array<i64: 1, 1, 8, 8>}]} {
    %c0 = arith.constant 0 : index
    %c0_0 = arith.constant 0 : index
    %c0_1 = arith.constant 0 : index
    %c0_2 = arith.constant 0 : index
    %0 = vector.load %arg3[%c0, %c0_0, %c0_1, %c0_2] : memref<1x1x8x8xbf16, #tpu.memory_space<vmem>>, vector<1x1x8x8xbf16>
    %1 = vector.shape_cast %0 : vector<1x1x8x8xbf16> to vector<8x8xbf16>
    %2 = arith.extf %1 : vector<8x8xbf16> to vector<8x8xf32>
    %cst = arith.constant 0.353553385 : f32
    %3 = vector.broadcast %cst : f32 to vector<8x8xf32>
    %4 = arith.mulf %2, %3 : vector<8x8xf32>
    %5 = arith.truncf %4 : vector<8x8xf32> to vector<8x8xbf16>
    %c0_3 = arith.constant 0 : index
    %c0_4 = arith.constant 0 : index
    %c0_5 = arith.constant 0 : index
    %c0_6 = arith.constant 0 : index
    %6 = vector.load %arg4[%c0_3, %c0_4, %c0_5, %c0_6] : memref<1x1x8x8xbf16, #tpu.memory_space<vmem>>, vector<1x1x8x8xbf16>
    %7 = vector.shape_cast %6 : vector<1x1x8x8xbf16> to vector<8x8xbf16>
    %c0_7 = arith.constant 0 : index
    %c0_8 = arith.constant 0 : index
    %c0_9 = arith.constant 0 : index
    %c0_10 = arith.constant 0 : index
    %8 = vector.load %arg5[%c0_7, %c0_8, %c0_9, %c0_10] : memref<1x1x8x8xbf16, #tpu.memory_space<vmem>>, vector<1x1x8x8xbf16>
    %9 = vector.shape_cast %8 : vector<1x1x8x8xbf16> to vector<8x8xbf16>
    %cst_11 = arith.constant dense<0.000000e+00> : vector<8x8xf32>
    %10 = tpu.matmul %5, %7, %cst_11 {dimension_numbers = #tpu.dot_dimension_numbers<[1], [1], [0], [0], [0, 0, 1, 0], [], []>} : vector<8x8xbf16>, vector<8x8xbf16>, vector<8x8xf32> -> vector<8x8xf32>
    %cst_12 = arith.constant dense<0xFF800000> : vector<8xf32>
    %11 = vector.multi_reduction <maximumf>, %10, %cst_12 [1] : vector<8x8xf32> to vector<8xf32>
    %12 = vector.shape_cast %11 : vector<8xf32> to vector<8x1xf32>
    %13 = vector.broadcast %12 : vector<8x1xf32> to vector<8x8xf32>
    %14 = arith.subf %10, %13 : vector<8x8xf32>
    %15 = math.exp %14 : vector<8x8xf32>
    %cst_13 = arith.constant dense<0.000000e+00> : vector<8xf32>
    %16 = vector.multi_reduction <add>, %15, %cst_13 [1] : vector<8x8xf32> to vector<8xf32>
    %17 = vector.shape_cast %16 : vector<8xf32> to vector<8x1xf32>
    %18 = vector.broadcast %17 : vector<8x1xf32> to vector<8x8xf32>
    %19 = arith.divf %15, %18 : vector<8x8xf32>
    %c0_14 = arith.constant 0 : index
    %c0_15 = arith.constant 0 : index
    %c0_16 = arith.constant 0 : index
    %c0_17 = arith.constant 0 : index
    %20 = vector.load %arg7[%c0_14, %c0_15, %c0_16, %c0_17] : memref<1x1x8x8xf32, #tpu.memory_space<vmem>>, vector<1x1x8x8xf32>
    %21 = vector.shape_cast %20 : vector<1x1x8x8xf32> to vector<8x8xf32>
    %22 = vector.shape_cast %19 : vector<8x8xf32> to vector<1x1x8x8xf32>
    tpu.vector_store %arg7[%c0_14, %c0_15, %c0_16, %c0_17], %22 {strides = array<i32>} : memref<1x1x8x8xf32, #tpu.memory_space<vmem>>, vector<1x1x8x8xf32>,
    %23 = arith.truncf %19 : vector<8x8xf32> to vector<8x8xbf16>
    %cst_18 = arith.constant dense<0.000000e+00> : vector<8x8xf32>
    %24 = tpu.matmul %23, %9, %cst_18 {dimension_numbers = #tpu.dot_dimension_numbers<[1], [0], [0], [1], [0, 0, 1, 1], [], []>} : vector<8x8xbf16>, vector<8x8xbf16>, vector<8x8xf32> -> vector<8x8xf32>
    %25 = arith.truncf %24 : vector<8x8xf32> to vector<8x8xbf16>
    %c0_19 = arith.constant 0 : index
    %c0_20 = arith.constant 0 : index
    %c0_21 = arith.constant 0 : index
    %c0_22 = arith.constant 0 : index
    %26 = vector.load %arg6[%c0_19, %c0_20, %c0_21, %c0_22] : memref<1x1x8x8xbf16, #tpu.memory_space<vmem>>, vector<1x1x8x8xbf16>
    %27 = vector.shape_cast %26 : vector<1x1x8x8xbf16> to vector<8x8xbf16>
    %28 = vector.shape_cast %25 : vector<8x8xbf16> to vector<1x1x8x8xbf16>
    tpu.vector_store %arg6[%c0_19, %c0_20, %c0_21, %c0_22], %28 {strides = array<i32>} : memref<1x1x8x8xbf16, #tpu.memory_space<vmem>>, vector<1x1x8x8xbf16>,
    return
  }
  func.func @transform_0(%arg0: i32, %arg1: i32, %arg2: i32) -> (i32, i32, i32, i32) {
    %c0_i32 = arith.constant 0 : i32
    %c0_i32_0 = arith.constant 0 : i32
    return %arg0, %arg1, %arg2, %c0_i32 : i32, i32, i32, i32
  }
  func.func @transform_1(%arg0: i32, %arg1: i32, %arg2: i32) -> (i32, i32, i32, i32) {
    %c0_i32 = arith.constant 0 : i32
    %c0_i32_0 = arith.constant 0 : i32
    %c0_i32_1 = arith.constant 0 : i32
    return %arg0, %arg1, %c0_i32, %c0_i32_0 : i32, i32, i32, i32
  }
  func.func @transform_2(%arg0: i32, %arg1: i32, %arg2: i32) -> (i32, i32, i32, i32) {
    %c0_i32 = arith.constant 0 : i32
    %c0_i32_0 = arith.constant 0 : i32
    %c0_i32_1 = arith.constant 0 : i32
    return %arg0, %arg1, %c0_i32, %c0_i32_0 : i32, i32, i32, i32
  }
  func.func @transform_3(%arg0: i32, %arg1: i32, %arg2: i32) -> (i32, i32, i32, i32) {
    %c0_i32 = arith.constant 0 : i32
    %c0_i32_0 = arith.constant 0 : i32
    return %arg0, %arg1, %arg2, %c0_i32 : i32, i32, i32, i32
  }
  func.func @transform_4(%arg0: i32, %arg1: i32, %arg2: i32) -> (i32, i32, i32, i32) {
    %c0_i32 = arith.constant 0 : i32
    %c0_i32_0 = arith.constant 0 : i32
    return %arg0, %arg1, %arg2, %c0_i32 : i32, i32, i32, i32
  }
}

module attributes {stable_mosaic.version = 11 : i64} {
  func.func @_fc_res_ln_kernel(%arg0: i32, %arg1: memref<16x32xbf16, #tpu.memory_space<vmem>>, %arg2: memref<32x32xbf16, #tpu.memory_space<vmem>>, %arg3: memref<1x32xf32, #tpu.memory_space<vmem>>, %arg4: memref<16x32xf32, #tpu.memory_space<vmem>>, %arg5: memref<1x32xf32, #tpu.memory_space<vmem>>, %arg6: memref<1x32xf32, #tpu.memory_space<vmem>>, %arg7: memref<16x32xf32, #tpu.memory_space<vmem>>) attributes {dimension_semantics = [#tpu.dimension_semantics<parallel>], iteration_bounds = array<i64: 1>, scalar_prefetch = 0 : i64, scratch_operands = 0 : i64, tpu.core_type = #tpu.core_type<tc>, window_params = [{transform_indices = @transform_0, window_bounds = array<i64: 16, 32>}, {pipeline_mode = #tpu.pipeline_mode<synchronous>, transform_indices = @transform_1, window_bounds = array<i64: 32, 32>}, {pipeline_mode = #tpu.pipeline_mode<synchronous>, transform_indices = @transform_2, window_bounds = array<i64: 1, 32>}, {transform_indices = @transform_3, window_bounds = array<i64: 16, 32>}, {pipeline_mode = #tpu.pipeline_mode<synchronous>, transform_indices = @transform_4, window_bounds = array<i64: 1, 32>}, {pipeline_mode = #tpu.pipeline_mode<synchronous>, transform_indices = @transform_5, window_bounds = array<i64: 1, 32>}, {transform_indices = @transform_6, window_bounds = array<i64: 16, 32>}]} {
    %c0 = arith.constant 0 : index
    %c0_0 = arith.constant 0 : index
    %0 = vector.load %arg1[%c0, %c0_0] : memref<16x32xbf16, #tpu.memory_space<vmem>>, vector<16x32xbf16>
    %c0_1 = arith.constant 0 : index
    %c0_2 = arith.constant 0 : index
    %1 = vector.load %arg2[%c0_1, %c0_2] : memref<32x32xbf16, #tpu.memory_space<vmem>>, vector<32x32xbf16>
    %cst = arith.constant dense<0.000000e+00> : vector<16x32xf32>
    %2 = tpu.matmul %0, %1, %cst {dimension_numbers = #tpu.dot_dimension_numbers<[1], [0], [0], [1], [0, 0, 1, 1], [], []>} : vector<16x32xbf16>, vector<32x32xbf16>, vector<16x32xf32> -> vector<16x32xf32>
    %c0_3 = arith.constant 0 : index
    %c0_4 = arith.constant 0 : index
    %3 = vector.load %arg3[%c0_3, %c0_4] : memref<1x32xf32, #tpu.memory_space<vmem>>, vector<1x32xf32>
    %4 = vector.broadcast %3 : vector<1x32xf32> to vector<16x32xf32>
    %5 = arith.addf %2, %4 : vector<16x32xf32>
    %c0_5 = arith.constant 0 : index
    %c0_6 = arith.constant 0 : index
    %6 = vector.load %arg4[%c0_5, %c0_6] : memref<16x32xf32, #tpu.memory_space<vmem>>, vector<16x32xf32>
    %7 = arith.addf %5, %6 : vector<16x32xf32>
    %cst_7 = arith.constant dense<0.000000e+00> : vector<16xf32>
    %8 = vector.multi_reduction <add>, %7, %cst_7 [1] : vector<16x32xf32> to vector<16xf32>
    %9 = vector.shape_cast %8 : vector<16xf32> to vector<16x1xf32>
    %cst_8 = arith.constant 3.200000e+01 : f32
    %10 = vector.broadcast %cst_8 : f32 to vector<16x1xf32>
    %11 = arith.divf %9, %10 : vector<16x1xf32>
    %12 = vector.broadcast %11 : vector<16x1xf32> to vector<16x32xf32>
    %13 = arith.subf %7, %12 : vector<16x32xf32>
    %14 = arith.mulf %13, %13 : vector<16x32xf32>
    %cst_9 = arith.constant dense<0.000000e+00> : vector<16xf32>
    %15 = vector.multi_reduction <add>, %14, %cst_9 [1] : vector<16x32xf32> to vector<16xf32>
    %16 = vector.shape_cast %15 : vector<16xf32> to vector<16x1xf32>
    %cst_10 = arith.constant 3.200000e+01 : f32
    %17 = vector.broadcast %cst_10 : f32 to vector<16x1xf32>
    %18 = arith.divf %16, %17 : vector<16x1xf32>
    %19 = vector.broadcast %11 : vector<16x1xf32> to vector<16x32xf32>
    %20 = arith.subf %7, %19 : vector<16x32xf32>
    %cst_11 = arith.constant 9.99999974E-6 : f32
    %21 = vector.broadcast %cst_11 : f32 to vector<16x1xf32>
    %22 = arith.addf %18, %21 : vector<16x1xf32>
    %23 = math.rsqrt %22 : vector<16x1xf32>
    %24 = vector.broadcast %23 : vector<16x1xf32> to vector<16x32xf32>
    %25 = arith.mulf %20, %24 : vector<16x32xf32>
    %c0_12 = arith.constant 0 : index
    %c0_13 = arith.constant 0 : index
    %26 = vector.load %arg5[%c0_12, %c0_13] : memref<1x32xf32, #tpu.memory_space<vmem>>, vector<1x32xf32>
    %27 = vector.broadcast %26 : vector<1x32xf32> to vector<16x32xf32>
    %28 = arith.mulf %25, %27 : vector<16x32xf32>
    %c0_14 = arith.constant 0 : index
    %c0_15 = arith.constant 0 : index
    %29 = vector.load %arg6[%c0_14, %c0_15] : memref<1x32xf32, #tpu.memory_space<vmem>>, vector<1x32xf32>
    %30 = vector.broadcast %29 : vector<1x32xf32> to vector<16x32xf32>
    %31 = arith.addf %28, %30 : vector<16x32xf32>
    %c0_16 = arith.constant 0 : index
    %c0_17 = arith.constant 0 : index
    %32 = vector.load %arg7[%c0_16, %c0_17] : memref<16x32xf32, #tpu.memory_space<vmem>>, vector<16x32xf32>
    tpu.vector_store %arg7[%c0_16, %c0_17], %31 {strides = array<i32>} : memref<16x32xf32, #tpu.memory_space<vmem>>, vector<16x32xf32>,
    return
  }
  func.func @transform_0(%arg0: i32) -> (i32, i32) {
    %c0_i32 = arith.constant 0 : i32
    %c0_i32_0 = arith.constant 0 : i32
    return %arg0, %c0_i32 : i32, i32
  }
  func.func @transform_1(%arg0: i32) -> (i32, i32) {
    %c0_i32 = arith.constant 0 : i32
    %c0_i32_0 = arith.constant 0 : i32
    %c0_i32_1 = arith.constant 0 : i32
    return %c0_i32, %c0_i32_0 : i32, i32
  }
  func.func @transform_2(%arg0: i32) -> (i32, i32) {
    %c0_i32 = arith.constant 0 : i32
    %c0_i32_0 = arith.constant 0 : i32
    %c0_i32_1 = arith.constant 0 : i32
    return %c0_i32, %c0_i32_0 : i32, i32
  }
  func.func @transform_3(%arg0: i32) -> (i32, i32) {
    %c0_i32 = arith.constant 0 : i32
    %c0_i32_0 = arith.constant 0 : i32
    return %arg0, %c0_i32 : i32, i32
  }
  func.func @transform_4(%arg0: i32) -> (i32, i32) {
    %c0_i32 = arith.constant 0 : i32
    %c0_i32_0 = arith.constant 0 : i32
    %c0_i32_1 = arith.constant 0 : i32
    return %c0_i32, %c0_i32_0 : i32, i32
  }
  func.func @transform_5(%arg0: i32) -> (i32, i32) {
    %c0_i32 = arith.constant 0 : i32
    %c0_i32_0 = arith.constant 0 : i32
    %c0_i32_1 = arith.constant 0 : i32
    return %c0_i32, %c0_i32_0 : i32, i32
  }
  func.func @transform_6(%arg0: i32) -> (i32, i32) {
    %c0_i32 = arith.constant 0 : i32
    %c0_i32_0 = arith.constant 0 : i32
    return %arg0, %c0_i32 : i32, i32
  }
}

</mosaic_0001>

<bundles_post_ra>
// kernel: _lambda_.3
= control target key start
LH: loop header
LB: loop body
LE: loop exit
PB: predicated region body
PF: predicated region fallthrough
CT: control target
= control target key end

     0   :  { %15 = vsyncpa [#allocation3], 0  ;;  %s584_s0 = inlined_call_operand.hbm [shape: f32[16,32], index: 0, kind: input, shape index: {}]   ;;  %s585_s1 = inlined_call_operand.hbm [shape: f32[16,32], index: 1, kind: input, shape index: {}]   ;;  %s586_s2 = inlined_call_operand.hbm [shape: f32[16,32], index: 2, kind: input, shape index: {}]   ;;  %s587_s3 = inlined_call_operand.vmem [shape: bf16[32,32], index: 3, kind: input, shape index: {}]   ;;  %s588_s4 = inlined_call_operand.vmem [shape: f32[1,32], index: 4, kind: input, shape index: {}]   ;;  %s589_s5 = inlined_call_operand.hbm [shape: bf16[32,32], index: 5, kind: input, shape index: {}]   ;;  %s590_s6 = inlined_call_operand.vmem [shape: f32[1,32], index: 6, kind: input, shape index: {}]   ;;  %s591_s7 = inlined_call_operand.vmem [shape: bf16[16,32], index: 7, kind: output, shape index: {0}]   ;;  %s592_s8 = inlined_call_operand.vmem [shape: bf16[16,32], index: 8, kind: output, shape index: {1}]   ;;  %s593_s9 = inlined_call_operand.vmem [shape: bf16[16,32], index: 9, kind: output, shape index: {2}]  }
   0x1   :  { %16 = vsyncpa [#allocation5], 0 }
   0x2   :  { %17 = vsyncpa [#allocation8], 0  ;;  %s473_s30 = smov [#allocation4]   ;;  %s474_s11 = smov [#allocation2]  }
   0x3   :  { %s35_s10 = sshll.u32 %s473_s30, 4  ;;  %s23_s12 = sshll.u32 %s474_s11, 4  ;;  %s36_s10 = int_to_ptr.vmem [resolvable:$true] %s35_s10  ;;  %s24_s12 = int_to_ptr.vmem [resolvable:$true] %s23_s12 }
   0x4   :  { %s395_s13 = scalar_lea.vmem %s36_s10, 256  ;;  %p400_p1 = scmp.lt.s32.totalorder %s36_s10, %s36_s10 }
   0x5   :  { %p396_p0 = scmp.ne.s32.totalorder %s36_s10, %s395_s13  ;;  %p401_p2 = scmp.lt.s32.totalorder %s395_s13, %s395_s13 }
   0x7   :  { %p402_p3 = por %p401_p2, %p400_p1 }
   0x9   :  { %p403_p4 = pnand %p402_p3, %p396_p0 }
   0xb   :  { %406 = shalt.err (!%p403_p4)
}
   0xc   :  { %s475_s14 = smov 128   ;;  %s476_s15 = smov 8  }
   0xd   :  { %41 = dma.hbm_to_vmem [thread:$0]  %s585_s1, 256, %s36_s10, [#allocation5], %s475_s14, %s475_s14, %s476_s15  }
   0xe   :  { %s415_s18 = scalar_lea.vmem %s24_s12, 256  ;;  %p420_p6 = scmp.lt.s32.totalorder %s24_s12, %s24_s12 }
   0xf   :  { %p416_p5 = scmp.ne.s32.totalorder %s24_s12, %s415_s18  ;;  %p421_p7 = scmp.lt.s32.totalorder %s415_s18, %s415_s18 }
  0x11   :  { %p422_p8 = por %p421_p7, %p420_p6 }
  0x13   :  { %p423_p9 = pnand %p422_p8, %p416_p5 }
  0x15   :  { %426 = shalt.err (!%p423_p9)
}
  0x16   :  { %29 = dma.hbm_to_vmem [thread:$0]  %s584_s0, 256, %s24_s12, [#allocation3], %s475_s14, %s475_s14, %s476_s15  }
  0x17   :  { %s477_s21 = smov [#allocation6]   ;;  %s478_s23 = smov [#allocation7]  }
  0x18   :  { %s47_s22 = sshll.u32 %s477_s21, 4  ;;  %s63_s24 = sshll.u32 %s478_s23, 4  ;;  %s48_s22 = int_to_ptr.vmem [resolvable:$true] %s47_s22  ;;  %s64_s24 = int_to_ptr.vmem [resolvable:$true] %s63_s24 }
  0x19   :  { %s435_s25 = scalar_lea.vmem %s48_s22, 256  ;;  %p440_p11 = scmp.lt.s32.totalorder %s48_s22, %s48_s22 }
  0x1a   :  { %p436_p10 = scmp.ne.s32.totalorder %s48_s22, %s435_s25  ;;  %p441_p12 = scmp.lt.s32.totalorder %s435_s25, %s435_s25 }
  0x1c   :  { %p442_p13 = por %p441_p12, %p440_p11 }
  0x1e   :  { %p443_p0 = pnand %p442_p13, %p436_p10 }
  0x20   :  { %446 = shalt.err (!%p443_p0)
}
  0x21   :  { %53 = dma.hbm_to_vmem [thread:$0]  %s586_s2, 256, %s48_s22, [#allocation5], %s475_s14, %s475_s14, %s476_s15  }
  0x22   :  { %s455_s27 = scalar_lea.vmem %s64_s24, 256  ;;  %p460_p2 = scmp.lt.s32.totalorder %s64_s24, %s64_s24 }
  0x23   :  { %p456_p1 = scmp.ne.s32.totalorder %s64_s24, %s455_s27  ;;  %p461_p3 = scmp.lt.s32.totalorder %s455_s27, %s455_s27 }
  0x25   :  { %p462_p4 = por %p461_p3, %p460_p2 }
  0x27   :  { %p463_p5 = pnand %p462_p4, %p456_p1 }
  0x29   :  { %466 = shalt.err (!%p463_p5)
}
  0x2a   :  { %s479_s0 = smov 64   ;;  %s480_s28 = smov 4  }
  0x2b   :  { %69 = dma.hbm_to_vmem [thread:$0]  %s589_s5, 256, %s64_s24, [#allocation8], %s479_s0, %s479_s0, %s480_s28  }
  0x2c   :  { %467 = dma.done.wait [#allocation3], 256  }
  0x2d   :  { %468 = vsyncadd [#allocation3], 4294967040 }
  0x2e   :  { %469 = dma.done.wait [#allocation5], 512  }
  0x2f   :  { %470 = vsyncadd [#allocation5], 4294966784 }
  0x30   :  { %471 = dma.done.wait [#allocation8], 256  }
  0x31   :  { %472 = vsyncadd [#allocation8], 4294967040  ;;  %v481_v0 = vmov 0.0   ;;  %vm482_vm0 = vmmov 0   ;;  %v383_v1 = vld [vmem:[%s587_s3 + $0x8] sm:$0xff]   ;;  %v384_v2 = vld [vmem:[%s587_s3] sm:$0xff]  }
  0x32   :  { %349 = vmatprep.subr.bf16.mxu0 %v481_v0  ;;  %357 = vmatprep.subr.bf16.mxu1 %v481_v0  ;;  %v90_v3 = vld [vmem:[#allocation2] sm:$0xff]  ;;  %v91_v4 = vld [vmem:[#allocation2 + $0x8] sm:$0xff]  ;;  %v167_v5 = vld [vmem:[#allocation4] sm:$0xff]  ;;  %vm111_vm1 = vcmask 261120   ;;  %vm164_vm2 = vcmask 257024  }
  0x33   :  { %353 = vmatprep.mubr.msk.bf16.mxu0 %vm482_vm0, %v481_v0  ;;  %361 = vmatprep.mubr.msk.bf16.mxu1 %vm482_vm0, %v481_v0  ;;  %v168_v6 = vld [vmem:[#allocation4 + $0x8] sm:$0xff]  ;;  %v92_v7 = vpack.c.bf16 %v91_v4, %v90_v3  ;;  %v386_v10 = vld [vmem:[#allocation7] sm:$0xff]   ;;  %v224_v11 = vld [vmem:[#allocation6] sm:$0xff] }
  0x34   :  { %350 = vmatpush3.bf16.msra.mxu0 %v383_v1  ;;  %358 = vmatpush3.bf16.msra.mxu1 %v383_v1  ;;  %v169_v8 = vpack.c.bf16 %v168_v6, %v167_v5  ;;  %v385_v9 = vld [vmem:[#allocation7 + $0x8] sm:$0xff]   ;;  %v225_v12 = vld [vmem:[#allocation6 + $0x8] sm:$0xff]  ;;  %v319_v14 = vld [vmem:[%s588_s4] ss:$0 sm:$0xff] }
  0x35   :  { %351 = vmatprep.subr.bf16.mxu0 %v481_v0  ;;  %359 = vmatprep.subr.bf16.mxu1 %v481_v0  ;;  %v226_v13 = vpack.c.bf16 %v225_v12, %v224_v11  ;;  %v328_v28 = vld [vmem:[%s590_s6] ss:$0 sm:$0xff] }
  0x38   :  { %352 = vmatpush3.bf16.msra.mxu0 %v384_v2  ;;  %360 = vmatpush3.bf16.msra.mxu1 %v384_v2 }
  0x39   :  { %365 = vmatprep.subr.bf16.mxu0 %v481_v0 }
  0x3b   :  { %354 = vmatmul.mubr.msk.bf16.vlgmr.msra.gmra.mxu0 %vm111_vm1, %v92_v7  ;;  %362 = vmatmul.mubr.msk.bf16.vlgmr.msra.gmra.mxu1 %vm111_vm1, %v169_v8 }
  0x3c   :  { %366 = vmatpush3.bf16.msra.mxu0 %v385_v9  ;;  %369 = vmatprep.mubr.msk.bf16.mxu0 %vm482_vm0, %v481_v0 }
  0x3d   :  { %367 = vmatprep.subr.bf16.mxu0 %v481_v0 }
  0x40   :  { %368 = vmatpush3.bf16.msra.mxu0 %v386_v10 }
  0x43   :  { %370 = vmatmul.mubr.msk.bf16.vlgmr.msra.gmra.mxu0 %vm111_vm1, %v226_v13 }
  0xfb   :  { %v149_v15 = vpop.f32.mrf.mxu0  ;;  %v207_v16 = vpop.f32.mrf.mxu1 }
  0xfc   :  { %v150_v17 = vadd.f32 %v319_v14, %v149_v15  ;;  %v208_v18 = vadd.f32 %v319_v14, %v207_v16 }
  0xfd   :  { %v355_v19 = vpop.f32.mrf.mxu0  ;;  %v363_v20 = vpop.f32.mrf.mxu1 }
  0xfe   :  { %v334_v21 = vpack.c.bf16 %v150_v17, %v150_v17  ;;  %v336_v22 = vpack.c.bf16 %v208_v18, %v208_v18 }
  0xff   :  { %v152_v23 = vpop.f32.mrf.mxu0  ;;  %v210_v24 = vpop.f32.mrf.mxu1 }
 0x100   :  { %165 = vst.msk [vmem:[%s591_s7] sm:$0xf] %vm164_vm2, %v334_v21  ;;  %222 = vst.msk [vmem:[%s592_s8] sm:$0xf] %vm164_vm2, %v336_v22  ;;  %v153_v25 = vadd.f32 %v319_v14, %v152_v23  ;;  %v211_v26 = vadd.f32 %v319_v14, %v210_v24 }
 0x101   :  { %v356_v27 = vpop.f32.mrf.mxu0  ;;  %v364_v29 = vpop.f32.mrf.mxu1 }
 0x102   :  { %v335_v30 = vpack.c.bf16 %v153_v25, %v153_v25  ;;  %v337_v31 = vpack.c.bf16 %v211_v26, %v211_v26 }
 0x103   :  { %v287_v32 = vpop.f32.mrf.mxu0 }
 0x104   :  { %166 = vst.msk [vmem:[%s591_s7 + $0x4] sm:$0xf] %vm164_vm2, %v335_v30  ;;  %223 = vst.msk [vmem:[%s592_s8 + $0x4] sm:$0xf] %vm164_vm2, %v337_v31  ;;  %v288_v33 = vadd.f32 %v328_v28, %v287_v32 }
 0x105   :  { %v371_v34 = vpop.f32.mrf.mxu0 }
 0x106   :  { %v338_v35 = vpack.c.bf16 %v288_v33, %v288_v33 }
 0x107   :  { %v290_v36 = vpop.f32.mrf.mxu0 }
 0x108   :  { %302 = vst.msk [vmem:[%s593_s9] sm:$0xf] %vm164_vm2, %v338_v35  ;;  %v291_v37 = vadd.f32 %v328_v28, %v290_v36 }
 0x109   :  { %v372_v38 = vpop.f32.mrf.mxu0 }
 0x10a   :  { %v339_v39 = vpack.c.bf16 %v291_v37, %v291_v37 }
 0x10c   :  { %303 = vst.msk [vmem:[%s593_s9 + $0x4] sm:$0xf] %vm164_vm2, %v339_v39 }
 0x10d   :  { %316 = vsyncpa [#allocation3], 1 }
 0x10e   :  { %317 = vsyncpa [#allocation5], 1 }
 0x10f   :  { %318 = vsyncpa [#allocation8], 1 }

// kernel: _lambda_.4
= control target key start
LH: loop header
LB: loop body
LE: loop exit
PB: predicated region body
PF: predicated region fallthrough
CT: control target
= control target key end

     0   :  { %s1025_s0 = inlined_call_operand.vmem [shape: bf16[2,4,8,8], index: 0, kind: input, shape index: {}]   ;;  %s1026_s1 = inlined_call_operand.vmem [shape: bf16[2,4,8,8], index: 1, kind: input, shape index: {}]   ;;  %s1027_s2 = inlined_call_operand.vmem [shape: bf16[2,4,8,8], index: 2, kind: input, shape index: {}]   ;;  %s1028_s3 = inlined_call_operand.vmem [shape: bf16[2,4,8,8], index: 3, kind: output, shape index: {0}]   ;;  %s1029_s4 = inlined_call_operand.hbm [shape: f32[2,4,8,8], index: 4, kind: output, shape index: {1}]  }
   0x1   :  { %1030 = sst [smem:[#allocation5_spill]] %s1025_s0 }
   0x2   :  { %1031 = sst [smem:[#allocation6_spill]] %s1026_s1 }
   0x3   :  { %10 = vsyncpa [#allocation3], 0 }
   0x4   :  { %12 = vsyncpa [#allocation3 + $0x1], 0  ;;  %s880_s15 = smov 0   ;;  %s882_s16 = smov 0  }
   0x5   :  { %s884_s17 = smov 0   ;;  %s886_s18 = smov 0  }
   0x6   :  { %s888_s19 = smov 0   ;;  %s890_s20 = smov 0  }
   0x7   :  { %s892_s21 = smov 0   ;;  %s894_s22 = smov 0  }
   0x8 LB: > { %s644_s23 = sadd.s32 4294967295, %s850_s22   ;;  %s645_s24 = sadd.s32 4294967294, %s850_s22   ;;  %s850_s22 = sphi %s894_s22, %s18_s22   ;;  %s846_s21 = sphi %s892_s21, %s1042_s21   ;;  %s842_s20 = sphi %s890_s20, %s1041_s20   ;;  %s838_s19 = sphi %s888_s19, %s1040_s19   ;;  %s834_s18 = sphi %s886_s18, %s1039_s18   ;;  %s830_s17 = sphi %s884_s17, %s1038_s17   ;;  %s826_s16 = sphi %s882_s16, %s1037_s16   ;;  %s822_s15 = sphi %s880_s15, %s1036_s15  }
   0x9   : > { %s33_s25 = sadd.s32 1, %s842_s20  ;;  %s37_s26 = sadd.s32 1, %s846_s21 }
   0xa   : > { %p35_p0 = scmp.ge.s32.totalorder %s33_s25, 4  ;;  %p174_p1 = scmp.ne.s32.totalorder %s830_s17, %s826_s16 }
   0xb   : > { %p175_p2 = scmp.eq.s32.totalorder %s644_s23, 7  ;;  %p180_p5 = scmp.ne.s32.totalorder %s826_s16, %s822_s15 }
   0xc   : > { %s1044_s25 = smov (%p35_p0, %s33_s25), 0  ;;  %s1046_s26 = smov (!%p35_p0, %s37_s26), %s846_s21 }
   0xd   : > { %s158_s27 = ssub.s32 %s842_s20, %s1044_s25  ;;  %p931_p3 = por %p175_p2, %p174_p1 }
   0xe   : > { %p39_p4 = scmp.ge.s32.totalorder %s1046_s26, 2  ;;  %p181_p6 = scmp.eq.s32.totalorder %s645_s24, 7 }
   0xf   : > { %p648_p7 = scmp.ge.s32.totalorder %s850_s22, 1  ;;  %p235_p9 = scmp.lt.s32.totalorder %s850_s22, 9 }
  0x10   : > { %s1048_s26 = smov (%p39_p4, %s1046_s26), 0  ;;  %p940_p8 = por %p181_p6, %p180_p5 }
  0x11   : > { %s157_s30 = ssub.s32 %s846_s21, %s1048_s26  ;;  %s164_s5 = sadd.s32 1, %s830_s17 }
  0x12   : > { %s159_s6 = sor.u32 %s158_s27, %s157_s30  ;;  %p236_p10 = pnand %p648_p7, %p235_p9 }
  0x13   : > { %p162_p11 = scmp.eq.s32.totalorder %s159_s6, 0  ;;  %p294_p12 = scmp.lt.s32.totalorder (!%p236_p10), %s838_s19, 1 }
  0x14   : > { %239 = sbr.rel (%p236_p10) target bundleno = 746 (0x2ea), region = 32  ;;  %p296_p13 = scmp.lt.s32.totalorder (!%p236_p10), %s834_s18, 3 }
  0x15   : > { %s949_s7 = scalar_select %p162_p11, %s830_s17, %s164_s5  }
  0x16   : > { %s1034_s1 = sld [smem:[#allocation6_spill]] (!%p236_p10)  ;;  %s661_s13 = sshll.u32 (!%p236_p10), %s838_s19, 2 }
  0x17   : > { %s1035_s0 = sld [smem:[#allocation5_spill]] (!%p236_p10)  ;;  %s476_s14 = sadd.s32 (!%p236_p10), %s834_s18, %s661_s13 }
  0x19   : > { %v852_v0 = vmov 0.0   ;;  %vm853_vm0 = vmmov 0   ;;  %s295_s8 = scalar_select %p294_p12, %s838_s19, 1  ;;  %vm339_vm1 = vcmask 64512   ;;  %vm402_vm2 = vcmask 1043456  }
  0x1a   : > { %669 = vmatprep.subr.bf16.mxu0 %v852_v0  ;;  %671 = vmatprep.mubr.msk.bf16.mxu0 %vm853_vm0, %v852_v0  ;;  %s297_s9 = scalar_select %p296_p13, %s834_s18, 3 }
  0x1b   : > { %675 = vmatprep.subr.bf16.mxu1 %v852_v0  ;;  %677 = vmatprep.mubr.msk.bf16.mxu1 %vm853_vm0, %v852_v0  ;;  %s650_s10 = sshll.u32 %s295_s8, 2 }
  0x1c   : > { %s302_s11 = sadd.s32 %s650_s10, %s297_s9  ;;  %s291_s9 = sand.u32 1, %s826_s16  }
  0x1d   : > { %s955_s12 = sshll.u32 %s302_s11, 2  ;;  %s649_s10 = sshll.u32 %s291_s9, 3 }
  0x1e   : > { %s312_s23 = scalar_lea.vmem %s1034_s1, %s955_s12  ;;  %s304_s30 = scalar_lea.vmem %s1035_s0, %s955_s12 }
  0x1f   : > { %v337_v1 = vld [vmem:[%s312_s23] sm:$0xf]  ;;  %s320_s8 = scalar_lea.vmem %s1027_s2, %s955_s12  ;;  %s293_s11 = scalar_lea.vmem [#allocation2], %s649_s10 }
  0x20   : > { %v333_v2 = vld [vmem:[%s304_s30] sm:$0xf]  ;;  %v344_v3 = vsel %vm339_vm1, %v337_v1, 0  ;;  %s662_s23 = sshll.u32 %s476_s14, 7  ;;  %s480_s24 = sshll.u32 %s293_s11, 4  ;;  %s481_s24 = int_to_ptr.vmem [resolvable:$true] %s480_s24 }
  0x21   : > { %v334_v4 = vunpack.c.l.bf16 %v333_v2  ;;  %670 = vmatpush3.bf16.xpose.msra.mxu0 %v344_v3  ;;  %v338_v17 = vld [vmem:[%s320_s8] sm:$0xf]  ;;  %s478_s5 = scalar_lea.hbm %s1029_s4, %s662_s23  ;;  %s461_s6 = scalar_lea.sflag [#allocation3], %s291_s9 }
  0x22   : > { %v404_v18 = vsel %vm402_vm2, %v338_v17, 0  ;;  %s758_s8 = scalar_lea.vmem %s481_s24, 128  ;;  %s854_s10 = smov [#allocation2]  }
  0x23   : > { %v335_v5 = vmul.f32 0.35355338, %v334_v4  ;;  %676 = vmatpush3.bf16.msra.mxu1 %v404_v18  ;;  %p759_p0 = scmp.ne.s32.totalorder %s481_s24, %s758_s8  ;;  %s762_s0 = sshll.u32 %s854_s10, 4  ;;  %s763_s0 = int_to_ptr.vmem [resolvable:$false] %s762_s0 }
  0x24   : > { %s764_s1 = scalar_lea.vmem %s763_s0, 256  ;;  %p765_p4 = scmp.lt.s32.totalorder %s481_s24, %s763_s0 }
  0x25   : > { %v336_v6 = vpack.c.bf16 %v335_v5, %v335_v5  ;;  %p760_p1 = pnand %p759_p0, %p931_p3  ;;  %p766_p5 = scmp.lt.s32.totalorder %s764_s1, %s758_s8 }
  0x27   : > { %p761_p2 = pneg %p760_p1  ;;  %p767_p6 = por %p766_p5, %p765_p4 }
  0x28   : > { %672 = vmatmul.mubr.msk.bf16.vlgmr.msra.gmra.mxu0 %vm339_vm1, %v336_v6 }
  0x29   : > { %p768_p7 = pnand %p767_p6, %p761_p2 }
  0xe8   : > { %v380_v7 = vpop.f32.mrf.mxu0 }
  0xe9   : > { %v386_v8 = vsel %vm339_vm1, %v380_v7, -inf }
  0xea   : > { %387 = vmax.xlane.f32.xlu0 %v386_v8  ;;  %v673_v9 = vpop.f32.mrf.mxu0 }
  0xec   : > { %v383_v10 = vpop.f32.mrf.mxu0 }
  0xee   : > { %v674_v11 = vpop.f32.mrf.mxu0 }
 0x173   : > { %v388_v12 = vpop.xlane.xlu0 %387 }
 0x174   : > { %v389_v13 = vsub.f32 %v380_v7, %v388_v12 }
 0x176   : > { %v390_v14 = vmul.f32 1.442695, %v389_v13 }
 0x178   : > { %754 = vpow2.f32 %v390_v14 }
 0x185   : > { %v755_v15 = vpop.eup %754 }
 0x186   : > { %v392_v16 = vsel %vm339_vm1, %v755_v15, 0.0 }
 0x187   : > { %393 = vadd.xlane.f32.xlu0 %v392_v16 }
 0x210   : > { %v394_v19 = vpop.xlane.xlu0 %393 }
 0x211   : > { %756 = vrcp.f32 %v394_v19 }
 0x21e   : > { %v757_v20 = vpop.eup %756 }
 0x21f   : > { %v396_v21 = vmul.f32 %v757_v20, %v755_v15 }
 0x221   : > { %v398_v22 = vpack.c.bf16 %v396_v21, %v396_v21  ;;  %397 = vst.msk [vmem:[%s293_s11] sm:$0xff] %vm339_vm1, %v396_v21 }
 0x223   : > { %678 = vmatmul.mubr.msk.bf16.vlgmr.msra.gmra.mxu1 %vm339_vm1, %v398_v22 }
 0x224   : > { %771 = shalt.err (!%p768_p7)
}
 0x225   : > { %s772_s18 = scalar_lea.hbm %s478_s5, 128  ;;  %s776_s11 = scalar_lea.hbm %s1029_s4, 1024 }
 0x226   : > { %p773_p9 = scmp.ne.s32.totalorder %s478_s5, %s772_s18  ;;  %p777_p12 = scmp.lt.s32.totalorder %s478_s5, %s1029_s4 }
 0x227   : > { %p778_p13 = scmp.lt.s32.totalorder %s776_s11, %s772_s18 }
 0x228   : > { %p774_p10 = pnand %p773_p9, %p931_p3 }
 0x229   : > { %p779_p0 = por %p778_p13, %p777_p12 }
 0x22a   : > { %p775_p11 = pneg %p774_p10 }
 0x22c   : > { %p780_p1 = pnand %p779_p0, %p775_p11 }
 0x22e   : > { %783 = shalt.err (!%p780_p1)
}
 0x22f   : > { %681 = dma.vmem_to_hbm [thread:$0]  (%p931_p3), %s481_s24, 128, %s478_s5, %s461_s6   ;;  %vm447_vm3 = vcmask 60416  }
 0x230   : > { %s331_s23 = scalar_lea.vmem %s1028_s3, %s955_s12 }
 0x2e3   : > { %v440_v23 = vpop.f32.mrf.mxu1 }
 0x2e4   : > { %v446_v24 = vpack.c.bf16 %v440_v23, %v440_v23 }
 0x2e5   : > { %v679_v25 = vpop.f32.mrf.mxu1 }
 0x2e6   : > { %448 = vst.msk [vmem:[%s331_s23] sm:$0xf] %vm447_vm3, %v446_v24 }
 0x2e7   : > { %v443_v26 = vpop.f32.mrf.mxu1 }
 0x2e9   : > { %v680_v27 = vpop.f32.mrf.mxu1 }
 0x2ea PF: > { %p687_p2 = scmp.ge.s32.totalorder %s850_s22, 2  ;;  %s506_s27 = sand.u32 1, %s822_s15  }
 0x2eb   : > { %s507_s28 = scalar_lea.sflag [#allocation3], %s506_s27 }
 0x2ec   : > { %p684_p4 = pnand %p687_p2, %p940_p8 }
 0x2ee   : > { %p685_p3 = pneg %p684_p4 }
 0x2f0   : > { %817 = dma.done.wait (%p685_p3), %s507_s28, 128  }
 0x2f1   : > { %819 = vsyncadd (%p685_p3), %s507_s28, 4294967168  ;;  %s18_s22 = sadd.s32 1, %s850_s22   ;;  %s1036_s15 = smov %s826_s16 }
 0x2f2   : > { %p15_p5 = scmp.ge.s32.totalorder %s18_s22, 10   ;;  %s1037_s16 = smov %s830_s17 }
 0x2f3   : > { %s1038_s17 = smov %s949_s7  ;;  %s1039_s18 = smov %s842_s20 }
 0x2f4   : > { %s1040_s19 = smov %s846_s21  ;;  %s1041_s20 = smov %s1044_s25 }
 0x2f5   : > { %s1042_s21 = smov %s1048_s26  ;;  %17 = sbr.rel (!%p15_p5) target bundleno = 8 (0x8), region = 85 }
 0x2fa   :  { %512 = vsyncpa [#allocation3], 1 }
 0x2fb   :  { %514 = vsyncpa [#allocation3 + $0x1], 1 }

// kernel: _lambda_.5
= control target key start
LH: loop header
LB: loop body
LE: loop exit
PB: predicated region body
PF: predicated region fallthrough
CT: control target
= control target key end

     0   :  { %v219_v1 = vmov 0.0   ;;  %vm220_vm0 = vmmov 0   ;;  %s293_s0 = inlined_call_operand.vmem [shape: bf16[16,32], index: 0, kind: input, shape index: {}]   ;;  %s294_s1 = inlined_call_operand.vmem [shape: bf16[32,32], index: 1, kind: input, shape index: {}]   ;;  %s295_s2 = inlined_call_operand.vmem [shape: f32[1,32], index: 2, kind: input, shape index: {}]   ;;  %s296_s3 = inlined_call_operand.vmem [shape: f32[16,32], index: 3, kind: input, shape index: {}]   ;;  %s297_s4 = inlined_call_operand.vmem [shape: f32[1,32], index: 4, kind: input, shape index: {}]   ;;  %s298_s5 = inlined_call_operand.vmem [shape: f32[1,32], index: 5, kind: input, shape index: {}]   ;;  %s299_s6 = inlined_call_operand.hbm [shape: f32[16,32], index: 6, kind: output, shape index: {}]  }
   0x1   :  { %v190_v0 = vld [vmem:[%s294_s1 + $0x8] sm:$0xff]   ;;  %177 = vmatprep.subr.bf16.mxu0 %v219_v1  ;;  %v191_v2 = vld [vmem:[%s294_s1] sm:$0xff]   ;;  %181 = vmatprep.mubr.msk.bf16.mxu0 %vm220_vm0, %v219_v1 }
   0x2   :  { %178 = vmatpush3.bf16.msra.mxu0 %v190_v0 }
   0x3   :  { %179 = vmatprep.subr.bf16.mxu0 %v219_v1 }
   0x4   :  { %11 = vsyncpa [#allocation3], 0  ;;  %v192_v3 = vld [vmem:[%s293_s0] sm:$0xff]   ;;  %vm55_vm1 = vcmask 261120   ;;  %v101_v11 = vld [vmem:[%s296_s3 + $0x8] sm:$0xff]  ;;  %s221_s9 = smov [#allocation2]  }
   0x5   :  { %v167_v4 = vld [vmem:[%s295_s2] ss:$0 sm:$0xff]  ;;  %s156_s10 = sshll.u32 %s221_s9, 4  ;;  %s157_s10 = int_to_ptr.vmem [resolvable:$true] %s156_s10 }
   0x6   :  { %180 = vmatpush3.bf16.msra.mxu0 %v191_v2  ;;  %v100_v6 = vld [vmem:[%s296_s3] sm:$0xff]  ;;  %s197_s11 = scalar_lea.vmem %s157_s10, 256  ;;  %p202_p1 = scmp.lt.s32.totalorder %s157_s10, %s157_s10 }
   0x7   :  { %v172_v34 = vld [vmem:[%s297_s4] ss:$0 sm:$0xff]  ;;  %p198_p0 = scmp.ne.s32.totalorder %s157_s10, %s197_s11  ;;  %p203_p2 = scmp.lt.s32.totalorder %s197_s11, %s197_s11 }
   0x8   :  { %v173_v36 = vld [vmem:[%s298_s5] ss:$0 sm:$0xff] }
   0x9   :  { %182 = vmatmul.mubr.msk.bf16.vlgmr.msra.gmra.mxu0 %vm55_vm1, %v192_v3  ;;  %p204_p3 = por %p203_p2, %p202_p1 }
   0xb   :  { %p205_p4 = pnand %p204_p3, %p198_p0 }
  0xc9   :  { %v93_v5 = vpop.f32.mrf.mxu0 }
  0xca   :  { %v94_v7 = vadd.f32 %v167_v4, %v93_v5 }
  0xcb   :  { %v183_v8 = vpop.f32.mrf.mxu0 }
  0xcc   :  { %v102_v9 = vadd.f32 %v100_v6, %v94_v7 }
  0xcd   :  { %v96_v10 = vpop.f32.mrf.mxu0 }
  0xce   :  { %v97_v12 = vadd.f32 %v167_v4, %v96_v10  ;;  %v104_v13 = vsel %vm55_vm1, %v102_v9, 0.0 }
  0xcf   :  { %105 = vadd.xlane.f32.xlu0 %v104_v13  ;;  %v184_v14 = vpop.f32.mrf.mxu0 }
  0xd0   :  { %v103_v15 = vadd.f32 %v101_v11, %v97_v12 }
  0xd2   :  { %v107_v16 = vsel %vm55_vm1, %v103_v15, 0.0 }
  0xd3   :  { %108 = vadd.xlane.f32.xlu0 %v107_v16 }
 0x158   :  { %v106_v17 = vpop.xlane.xlu0 %105 }
 0x159   :  { %v111_v18 = vmul.f32 0.03125, %v106_v17 }
 0x15b   :  { %v113_v19 = vsub.f32 %v102_v9, %v111_v18 }
 0x15c   :  { %v109_v20 = vpop.xlane.xlu0 %108 }
 0x15d   :  { %v112_v21 = vmul.f32 0.03125, %v109_v20  ;;  %v115_v22 = vmul.f32 %v113_v19, %v113_v19 }
 0x15f   :  { %v114_v23 = vsub.f32 %v103_v15, %v112_v21  ;;  %v117_v24 = vsel %vm55_vm1, %v115_v22, 0.0 }
 0x160   :  { %118 = vadd.xlane.f32.xlu1 %v117_v24 }
 0x161   :  { %v116_v25 = vmul.f32 %v114_v23, %v114_v23 }
 0x163   :  { %v120_v26 = vsel %vm55_vm1, %v116_v25, 0.0 }
 0x164   :  { %121 = vadd.xlane.f32.xlu1 %v120_v26 }
 0x1e9   :  { %v119_v27 = vpop.xlane.xlu1 %118 }
 0x1ea   :  { %v123_v28 = vmul.f32 0.03125, %v119_v27 }
 0x1ec   :  { %v125_v29 = vadd.f32 1e-05, %v123_v28 }
 0x1ed   :  { %v122_v30 = vpop.xlane.xlu1 %121 }
 0x1ee   :  { %193 = vrsqrt.f32 %v125_v29  ;;  %v124_v31 = vmul.f32 0.03125, %v122_v30 }
 0x1f0   :  { %v126_v32 = vadd.f32 1e-05, %v124_v31 }
 0x1f2   :  { %195 = vrsqrt.f32 %v126_v32 }
 0x1fb   :  { %v194_v33 = vpop.eup %193 }
 0x1fc   :  { %v129_v35 = vmul.f32 %v194_v33, %v113_v19 }
 0x1fe   :  { %v138_v37 = vmul.f32 %v172_v34, %v129_v35 }
 0x1ff   :  { %v196_v38 = vpop.eup %195 }
 0x200   :  { %v130_v39 = vmul.f32 %v196_v38, %v114_v23  ;;  %v147_v40 = vadd.f32 %v173_v36, %v138_v37 }
 0x202   :  { %v139_v41 = vmul.f32 %v172_v34, %v130_v39  ;;  %149 = vst.msk [vmem:[#allocation2] sm:$0xff] %vm55_vm1, %v147_v40 }
 0x204   :  { %v148_v42 = vadd.f32 %v173_v36, %v139_v41 }
 0x206   :  { %150 = vst.msk [vmem:[#allocation2 + $0x8] sm:$0xff] %vm55_vm1, %v148_v42 }
 0x207   :  { %208 = shalt.err (!%p205_p4)
}
 0x208   :  { %s222_s4 = smov 128   ;;  %s223_s5 = smov 8  }
 0x209   :  { %162 = dma.vmem_to_hbm [thread:$0]  %s157_s10, 256, %s299_s6, [#allocation3], %s222_s4, %s222_s4, %s223_s5  }
 0x20a   :  { %217 = dma.done.wait [#allocation3], 256  }
 0x20b   :  { %218 = vsyncadd [#allocation3], 4294967040 }
 0x20c   :  { %166 = vsyncpa [#allocation3], 1 }

</bundles_post_ra>
